<compile_context>
chip_gen: v7x
topology: tpu7x:2x2x1
jax: 0.10.0
libtpu: 0.0.40
codegen_flags: <defaults>
</compile_context>

<pallas_src>
import jax
import jax.numpy as jnp
from jax.experimental import pallas as pl
from jax.experimental.pallas import tpu as pltpu


def node_dropout_kernel(x_ref, rmask_ref, cmask_ref, o_ref):
    # o[i, j] = keep[i] * x[i, j] * keep[j]
    # (tm, tn) * (tm, 1) * (1, tn) -> broadcast elementwise on the VPU.
    o_ref[...] = x_ref[...] * rmask_ref[...] * cmask_ref[...]


def node_dropout_apply(X, keep, *, tm=1024, tn=1024, in_place=False):
    """Apply new_X = diag(keep) @ X @ diag(keep) with a 2-D tiled Pallas kernel.

    No padding: the grid is cdiv-based and Pallas masks the ragged edge blocks
    (correct here because the kernel is purely elementwise).
    """
    N = X.shape[0]
    assert X.shape == (N, N)

    # Clamp tiles for small graphs: a block dim equal to the full array dim is
    # always a legal block shape (independent of the (8,128) / dtype-packing
    # divisibility rule), so small / ragged N needs no padding at all.
    tm = N if N <= tm else tm        # tm default is a multiple of 32 (all dtypes)
    tn = N if N <= tn else tn        # tn default is a multiple of 128 (lane-dense)

    keep = keep.astype(X.dtype)
    rmask = keep.reshape(N, 1)
    cmask = keep.reshape(1, N)

    itemsize = X.dtype.itemsize
    cost = pl.CostEstimate(
        flops=2 * N * N,
        transcendentals=0,
        bytes_accessed=(2 * N * N + 2 * N) * itemsize,
    )

    extra_kwargs = {}
    if in_place:
        # X is input index 0 (no scalar-prefetch args); new_X overwrites it.
        extra_kwargs["input_output_aliases"] = {0: 0}

    return pl.pallas_call(
        node_dropout_kernel,
        out_shape=jax.ShapeDtypeStruct((N, N), X.dtype),
        grid_spec=pltpu.PrefetchScalarGridSpec(
            num_scalar_prefetch=0,
            # Row blocks outer, column blocks inner: row-mask block index is
            # constant across the inner axis (stays resident).
            grid=(pl.cdiv(N, tm), pl.cdiv(N, tn)),
            in_specs=[
                pl.BlockSpec((tm, tn), lambda i, j: (i, j)),   # X tile
                pl.BlockSpec((tm, 1), lambda i, j: (i, 0)),    # row keep-mask
                pl.BlockSpec((1, tn), lambda i, j: (0, j)),    # col keep-mask
            ],
            out_specs=pl.BlockSpec((tm, tn), lambda i, j: (i, j)),
        ),
        compiler_params=pltpu.CompilerParams(
            dimension_semantics=("parallel", "parallel"),
            vmem_limit_bytes=32 * 1024 * 1024,
        ),
        cost_estimate=cost,
        **extra_kwargs,
    )(X, rmask, cmask)


def make_keep_mask(key, num_users, num_items, dropout_prob, dtype=jnp.float32):
    """Build the keep mask exactly as the torch module does (randperm + slice)."""
    # TODO(synk): torch.randperm RNG stream differs from jax.random; node
    # selection is statistically equivalent, not bit-identical.
    ku, ki = jax.random.split(key)
    n_drop_u = int(num_users * dropout_prob)
    n_drop_i = int(num_items * dropout_prob)
    user_drop = jax.random.permutation(ku, num_users)[:n_drop_u]
    item_drop = jax.random.permutation(ki, num_items)[:n_drop_i]
    N = num_users + num_items
    flag = jnp.zeros((N,), dtype=bool)
    flag = flag.at[user_drop].set(True)
    flag = flag.at[item_drop + num_users].set(True)
    return jnp.logical_not(flag).astype(dtype)


def node_dropout_forward(X, key, *, num_users, num_items, dropout_prob,
                         training=True, in_place=False):
    if not training:
        return X
    keep = make_keep_mask(key, num_users, num_items, dropout_prob, X.dtype)
    return node_dropout_apply(X, keep, in_place=in_place)


if __name__ == "__main__":
    # Small, deliberately ragged N (not a multiple of 128) to exercise the
    # full-dim-block path.
    num_users, num_items = 72, 88
    N = num_users + num_items            # 160
    dropout_prob = 0.3

    root = jax.random.PRNGKey(0)
    k_graph, k_drop = jax.random.split(root)

    # Deterministic synthetic "sparse" adjacency represented densely.
    dense_vals = jax.random.uniform(k_graph, (N, N), dtype=jnp.float32)
    X = jnp.where(dense_vals > 0.9, dense_vals, 0.0)

    out = node_dropout_forward(
        X, k_drop, num_users=num_users, num_items=num_items,
        dropout_prob=dropout_prob, training=True)
    out = jax.block_until_ready(out)

    # Pure-JAX reference: diag(keep) @ X @ diag(keep)
    keep_ref = make_keep_mask(k_drop, num_users, num_items, dropout_prob,
                              X.dtype)
    ref = keep_ref[:, None] * X * keep_ref[None, :]

    assert out.shape == X.shape and out.dtype == X.dtype
    assert jnp.allclose(out, ref, atol=1e-6)

    # Ragged multi-block grid path (tiles smaller than N -> masked edge blocks).
    out_small_tiles = jax.block_until_ready(
        node_dropout_apply(X, keep_ref, tm=128, tn=128))
    assert jnp.allclose(out_small_tiles, ref, atol=1e-6)

    # Exactly-divisible shape also works, plus the in-place aliasing path.
    N2 = 256
    dense2 = jax.random.uniform(k_graph, (N2, N2), dtype=jnp.float32)
    X2 = jnp.where(dense2 > 0.9, dense2, 0.0)
    keep2 = make_keep_mask(k_drop, 128, 128, dropout_prob, X2.dtype)
    ref2 = keep2[:, None] * X2 * keep2[None, :]
    out2 = jax.block_until_ready(node_dropout_apply(X2, keep2))
    assert jnp.allclose(out2, ref2, atol=1e-6)
    out2_inplace = jax.block_until_ready(
        node_dropout_apply(X2, keep2, in_place=True))
    assert jnp.allclose(out2_inplace, ref2, atol=1e-6)

    # eval mode is identity
    out_eval = node_dropout_forward(
        X, k_drop, num_users=num_users, num_items=num_items,
        dropout_prob=dropout_prob, training=False)
    assert jnp.array_equal(out_eval, X)

    print("KERNEL_OK")
</pallas_src>

<mosaic_0001>
module attributes {stable_mosaic.version = 11 : i64} {
  func.func @node_dropout_kernel(%arg0: i32, %arg1: i32, %arg2: memref<160x160xf32, #tpu.memory_space<vmem>>, %arg3: memref<160x1xf32, #tpu.memory_space<vmem>>, %arg4: memref<1x160xf32, #tpu.memory_space<vmem>>, %arg5: memref<160x160xf32, #tpu.memory_space<vmem>>) attributes {dimension_semantics = [#tpu.dimension_semantics<parallel>, #tpu.dimension_semantics<parallel>], iteration_bounds = array<i64: 1, 1>, scalar_prefetch = 0 : i64, scratch_operands = 0 : i64, tpu.core_type = #tpu.core_type<tc>, window_params = [{transform_indices = @transform_0, window_bounds = array<i64: 160, 160>}, {transform_indices = @transform_1, window_bounds = array<i64: 160, 1>}, {transform_indices = @transform_2, window_bounds = array<i64: 1, 160>}, {transform_indices = @transform_3, window_bounds = array<i64: 160, 160>}]} {
    %c0 = arith.constant 0 : index
    %c0_0 = arith.constant 0 : index
    %0 = vector.load %arg2[%c0, %c0_0] : memref<160x160xf32, #tpu.memory_space<vmem>>, vector<160x160xf32>
    %c0_1 = arith.constant 0 : index
    %c0_2 = arith.constant 0 : index
    %1 = vector.load %arg3[%c0_1, %c0_2] : memref<160x1xf32, #tpu.memory_space<vmem>>, vector<160x1xf32>
    %2 = vector.broadcast %1 : vector<160x1xf32> to vector<160x160xf32>
    %3 = arith.mulf %0, %2 : vector<160x160xf32>
    %c0_3 = arith.constant 0 : index
    %c0_4 = arith.constant 0 : index
    %4 = vector.load %arg4[%c0_3, %c0_4] : memref<1x160xf32, #tpu.memory_space<vmem>>, vector<1x160xf32>
    %5 = vector.broadcast %4 : vector<1x160xf32> to vector<160x160xf32>
    %6 = arith.mulf %3, %5 : vector<160x160xf32>
    %c0_5 = arith.constant 0 : index
    %c0_6 = arith.constant 0 : index
    %7 = vector.load %arg5[%c0_5, %c0_6] : memref<160x160xf32, #tpu.memory_space<vmem>>, vector<160x160xf32>
    tpu.vector_store %arg5[%c0_5, %c0_6], %6 {strides = array<i32>} : memref<160x160xf32, #tpu.memory_space<vmem>>, vector<160x160xf32>,
    return
  }
  func.func @transform_0(%arg0: i32, %arg1: i32) -> (i32, i32) {
    %c0_i32 = arith.constant 0 : i32
    return %arg0, %arg1 : i32, i32
  }
  func.func @transform_1(%arg0: i32, %arg1: i32) -> (i32, i32) {
    %c0_i32 = arith.constant 0 : i32
    %c0_i32_0 = arith.constant 0 : i32
    return %arg0, %c0_i32 : i32, i32
  }
  func.func @transform_2(%arg0: i32, %arg1: i32) -> (i32, i32) {
    %c0_i32 = arith.constant 0 : i32
    %c0_i32_0 = arith.constant 0 : i32
    return %c0_i32, %arg1 : i32, i32
  }
  func.func @transform_3(%arg0: i32, %arg1: i32) -> (i32, i32) {
    %c0_i32 = arith.constant 0 : i32
    return %arg0, %arg1 : i32, i32
  }
}

</mosaic_0001>

<bundles_post_ra>
// kernel: tpu_custom_call.1
= control target key start
LH: loop header
LB: loop body
LE: loop exit
PB: predicated region body
PF: predicated region fallthrough
CT: control target
= control target key end

     0   :  { %8 = vsyncpa [#allocation3], 0  ;;  %s576_s0 = inlined_call_operand.hbm [shape: f32[160,160], index: 0, kind: input, shape index: {}]   ;;  %s577_s1 = inlined_call_operand.vmem [shape: f32[160,1], index: 1, kind: input, shape index: {}]   ;;  %s578_s2 = inlined_call_operand.vmem [shape: f32[1,160], index: 2, kind: input, shape index: {}]   ;;  %s579_s3 = inlined_call_operand.hbm [shape: f32[160,160], index: 3, kind: output, shape index: {}]  }
   0x1   :  { %9 = vsyncpa [#allocation4], 0  ;;  %s394_s12 = smov [#allocation2]   ;;  %s346_s16 = scalar_lea.hbm %s576_s0, 5120 }
   0x2   :  { %s15_s13 = sshll.u32 %s394_s12, 4  ;;  %p347_p0 = scmp.ne.s32.totalorder %s576_s0, %s346_s16  ;;  %s16_s13 = int_to_ptr.vmem [resolvable:$true] %s15_s13 }
   0x3   :  { %p350_p1 = scmp.lt.u32.totalorder %s346_s16, %s576_s0 }
   0x5   :  { %p352_p2 = pnand %p350_p1, %p347_p0 }
   0x7   :  { %355 = shalt.err (!%p352_p2)
}
   0x8   :  { %s356_s21 = scalar_lea.vmem %s16_s13, 5120  ;;  %p361_p4 = scmp.lt.s32.totalorder %s16_s13, %s16_s13 }
   0x9   :  { %p357_p3 = scmp.ne.s32.totalorder %s16_s13, %s356_s21  ;;  %p362_p5 = scmp.lt.s32.totalorder %s356_s21, %s356_s21 }
   0xb   :  { %p363_p6 = por %p362_p5, %p361_p4 }
   0xd   :  { %p364_p7 = pnand %p363_p6, %p357_p3 }
   0xf   :  { %367 = shalt.err (!%p364_p7)
}
  0x10   :  { %s395_s22 = smov 256   ;;  %s396_s23 = smov 16  }
  0x11   :  { %21 = dma.hbm_to_vmem [thread:$0]  %s576_s0, 5120, %s16_s13, [#allocation3], %s395_s22, %s395_s22, %s396_s23  }
  0x12   :  { %390 = dma.done.wait [#allocation3], 5120  }
  0x13   :  { %391 = vsyncadd [#allocation3], 4294962176  ;;  %v397_v0 = vmov 0   ;;  %v71_v1 = vld [vmem:[%s577_s1 + $0x10] sm:$0xff]  ;;  %v69_v2 = vld [vmem:[%s577_s1] sm:$0xff]  ;;  %v231_v21 = vlaneseq  ;;  %vm282_vm0 = vcmask 261120  }
  0x14   :  { %345 = vset.pattern.permute.xlu1 %v397_v0  ;;  %344 = vset.pattern.permute.xlu0 %v397_v0  ;;  %v72_v3 = vld [vmem:[%s577_s1 + $0x18] sm:$0xff]  ;;  %v70_v4 = vld [vmem:[%s577_s1 + $0x8] sm:$0xff]  ;;  %v73_v6 = vld [vmem:[%s577_s1 + $0x20] sm:$0xff] }
  0x15   :  { %101 = vperm.xlu1 %345, %v71_v1   ;;  %91 = vperm.xlu0 %344, %v69_v2   ;;  %v74_v5 = vld [vmem:[%s577_s1 + $0x28] sm:$0xff]  ;;  %v76_v7 = vld [vmem:[%s577_s1 + $0x38] sm:$0xff]  ;;  %v75_v8 = vld [vmem:[%s577_s1 + $0x30] sm:$0xff]  ;;  %v232_v22 = vshrl.u32 %v231_v21, 7 }
  0x16   :  { %v78_v9 = vld [vmem:[%s577_s1 + $0x48] sm:$0xff]  ;;  %v77_v10 = vld [vmem:[%s577_s1 + $0x40] sm:$0xff]  ;;  %v80_v11 = vld [vmem:[%s577_s1 + $0x58] sm:$0xff] }
  0x17   :  { %v79_v12 = vld [vmem:[%s577_s1 + $0x50] sm:$0xff]  ;;  %v82_v13 = vld [vmem:[%s577_s1 + $0x68] sm:$0xff]  ;;  %v81_v14 = vld [vmem:[%s577_s1 + $0x60] sm:$0xff]  ;;  %v233_v23 = vsub.s32 0, %v232_v22  ;;  %v237_v24 = vsub.s32 1, %v232_v22 }
  0x18   :  { %v84_v15 = vld [vmem:[%s577_s1 + $0x78] sm:$0xff]  ;;  %v83_v16 = vld [vmem:[%s577_s1 + $0x70] sm:$0xff]  ;;  %v86_v17 = vld [vmem:[%s577_s1 + $0x88] sm:$0xff] }
  0x19   :  { %106 = vperm.xlu1 %345, %v72_v3   ;;  %96 = vperm.xlu0 %344, %v70_v4   ;;  %v85_v18 = vld [vmem:[%s577_s1 + $0x80] sm:$0xff]  ;;  %v88_v19 = vld [vmem:[%s577_s1 + $0x98] sm:$0xff]  ;;  %v87_v20 = vld [vmem:[%s577_s1 + $0x90] sm:$0xff]  ;;  %s398_s1 = smov [#allocation5]  }
  0x1a   :  { %v229_v25 = vld [vmem:[%s578_s2] sm:$0x3]  ;;  %v34_v27 = vld [vmem:[#allocation2 + $0x28] sm:$0xff]  ;;  %v35_v38 = vld [vmem:[#allocation2 + $0x30] sm:$0xff]  ;;  %s327_s2 = sshll.u32 %s398_s1, 4  ;;  %s328_s2 = int_to_ptr.vmem [resolvable:$true] %s327_s2 }
  0x1b   :  { %v33_v26 = vld [vmem:[#allocation2 + $0x20] sm:$0xff]  ;;  %v30_v29 = vld [vmem:[#allocation2 + $0x8] sm:$0xff]  ;;  %v497_v30 = vrot.slane %v229_v25, %v233_v23  ;;  %v499_v31 = vrot.slane %v229_v25, %v237_v24  ;;  %v36_v39 = vld [vmem:[#allocation2 + $0x38] sm:$0xff]  ;;  %s368_s14 = scalar_lea.vmem %s328_s2, 5120  ;;  %p373_p9 = scmp.lt.s32.totalorder %s328_s2, %s328_s2 }
  0x1c   :  { %v29_v28 = vld [vmem:[#allocation2] sm:$0xff]  ;;  %v31_v40 = vld [vmem:[#allocation2 + $0x10] sm:$0xff]  ;;  %v32_v41 = vld [vmem:[#allocation2 + $0x18] sm:$0xff]  ;;  %p369_p8 = scmp.ne.s32.totalorder %s328_s2, %s368_s14  ;;  %p374_p10 = scmp.lt.s32.totalorder %s368_s14, %s368_s14 }
  0x1d   :  { %116 = vperm.xlu1 %345, %v74_v5   ;;  %111 = vperm.xlu0 %344, %v73_v6   ;;  %v39_v52 = vld [vmem:[#allocation2 + $0x50] sm:$0xff]  ;;  %v40_v53 = vld [vmem:[#allocation2 + $0x58] sm:$0xff]  ;;  %v37_v54 = vld [vmem:[#allocation2 + $0x40] sm:$0xff] }
  0x1e   :  { %v38_v55 = vld [vmem:[#allocation2 + $0x48] sm:$0xff]  ;;  %v43_v2 = vld [vmem:[#allocation2 + $0x70] sm:$0xff]  ;;  %v44_v3 = vld [vmem:[#allocation2 + $0x78] sm:$0xff]  ;;  %p375_p11 = por %p374_p10, %p373_p9 }
  0x1f   :  { %v41_v4 = vld [vmem:[#allocation2 + $0x60] sm:$0xff]  ;;  %v42_v5 = vld [vmem:[#allocation2 + $0x68] sm:$0xff] }
  0x20   :  { %p376_p12 = pnand %p375_p11, %p369_p8 }
  0x21   :  { %126 = vperm.xlu1 %345, %v76_v7   ;;  %121 = vperm.xlu0 %344, %v75_v8  }
  0x25   :  { %136 = vperm.xlu1 %345, %v78_v9   ;;  %131 = vperm.xlu0 %344, %v77_v10  }
  0x29   :  { %146 = vperm.xlu1 %345, %v80_v11   ;;  %141 = vperm.xlu0 %344, %v79_v12  }
  0x2d   :  { %156 = vperm.xlu1 %345, %v82_v13   ;;  %151 = vperm.xlu0 %344, %v81_v14  }
  0x31   :  { %166 = vperm.xlu1 %345, %v84_v15   ;;  %161 = vperm.xlu0 %344, %v83_v16   ;;  %v47_v16 = vld [vmem:[#allocation2 + $0x90] sm:$0xff] }
  0x35   :  { %176 = vperm.xlu1 %345, %v86_v17   ;;  %171 = vperm.xlu0 %344, %v85_v18   ;;  %v48_v17 = vld [vmem:[#allocation2 + $0x98] sm:$0xff]  ;;  %v45_v18 = vld [vmem:[#allocation2 + $0x80] sm:$0xff] }
  0x39   :  { %186 = vperm.xlu1 %345, %v88_v19   ;;  %181 = vperm.xlu0 %344, %v87_v20   ;;  %v46_v19 = vld [vmem:[#allocation2 + $0x88] sm:$0xff] }
  0x94   :  { %v102_v32 = vpop.permute.xlu1 %101  ;;  %v92_v33 = vpop.permute.xlu0 %91 }
  0x95   :  { %v193_v34 = vmul.f32 %v102_v32, %v33_v26  ;;  %v194_v35 = vmul.f32 %v102_v32, %v34_v27  ;;  %v189_v36 = vmul.f32 %v92_v33, %v29_v28  ;;  %v190_v37 = vmul.f32 %v92_v33, %v30_v29  ;;  %v51_v32 = vld [vmem:[#allocation2 + $0xb0] sm:$0xff]  ;;  %v52_v33 = vld [vmem:[#allocation2 + $0xb8] sm:$0xff] }
  0x97   :  { %v245_v42 = vmul.f32 %v497_v30, %v193_v34  ;;  %v246_v43 = vmul.f32 %v499_v31, %v194_v35  ;;  %v241_v44 = vmul.f32 %v497_v30, %v189_v36  ;;  %v242_v45 = vmul.f32 %v499_v31, %v190_v37  ;;  %v49_v34 = vld [vmem:[#allocation2 + $0xa0] sm:$0xff]  ;;  %v50_v35 = vld [vmem:[#allocation2 + $0xa8] sm:$0xff] }
  0x98   :  { %v107_v46 = vpop.permute.xlu1 %106  ;;  %v97_v47 = vpop.permute.xlu0 %96 }
  0x99   :  { %286 = vst [vmem:[#allocation5 + $0x20] sm:$0xff] %v245_v42  ;;  %287 = vst.msk [vmem:[#allocation5 + $0x28] sm:$0xff] %vm282_vm0, %v246_v43  ;;  %v195_v48 = vmul.f32 %v107_v46, %v35_v38  ;;  %v196_v49 = vmul.f32 %v107_v46, %v36_v39  ;;  %v191_v50 = vmul.f32 %v97_v47, %v31_v40  ;;  %v55_v46 = vld [vmem:[#allocation2 + $0xd0] sm:$0xff] }
  0x9a   :  { %281 = vst [vmem:[#allocation5] sm:$0xff] %v241_v44  ;;  %283 = vst.msk [vmem:[#allocation5 + $0x8] sm:$0xff] %vm282_vm0, %v242_v45  ;;  %v192_v51 = vmul.f32 %v97_v47, %v32_v41  ;;  %v56_v47 = vld [vmem:[#allocation2 + $0xd8] sm:$0xff] }
  0x9b   :  { %v247_v56 = vmul.f32 %v497_v30, %v195_v48  ;;  %v248_v57 = vmul.f32 %v499_v31, %v196_v49  ;;  %v243_v58 = vmul.f32 %v497_v30, %v191_v50  ;;  %v53_v48 = vld [vmem:[#allocation2 + $0xc0] sm:$0xff]  ;;  %v54_v49 = vld [vmem:[#allocation2 + $0xc8] sm:$0xff] }
  0x9c   :  { %v244_v59 = vmul.f32 %v499_v31, %v192_v51  ;;  %v117_v60 = vpop.permute.xlu1 %116  ;;  %v112_v61 = vpop.permute.xlu0 %111 }
  0x9d   :  { %288 = vst [vmem:[#allocation5 + $0x30] sm:$0xff] %v247_v56  ;;  %289 = vst.msk [vmem:[#allocation5 + $0x38] sm:$0xff] %vm282_vm0, %v248_v57  ;;  %v199_v62 = vmul.f32 %v117_v60, %v39_v52  ;;  %v200_v63 = vmul.f32 %v117_v60, %v40_v53  ;;  %v197_v0 = vmul.f32 %v112_v61, %v37_v54  ;;  %v59_v60 = vld [vmem:[#allocation2 + $0xf0] sm:$0xff] }
  0x9e   :  { %284 = vst [vmem:[#allocation5 + $0x10] sm:$0xff] %v243_v58  ;;  %285 = vst.msk [vmem:[#allocation5 + $0x18] sm:$0xff] %vm282_vm0, %v244_v59  ;;  %v198_v1 = vmul.f32 %v112_v61, %v38_v55  ;;  %v60_v61 = vld [vmem:[#allocation2 + $0xf8] sm:$0xff] }
  0x9f   :  { %v251_v6 = vmul.f32 %v497_v30, %v199_v62  ;;  %v252_v7 = vmul.f32 %v499_v31, %v200_v63  ;;  %v249_v8 = vmul.f32 %v497_v30, %v197_v0  ;;  %v57_v62 = vld [vmem:[#allocation2 + $0xe0] sm:$0xff]  ;;  %v58_v63 = vld [vmem:[#allocation2 + $0xe8] sm:$0xff] }
  0xa0   :  { %v250_v9 = vmul.f32 %v499_v31, %v198_v1  ;;  %v127_v10 = vpop.permute.xlu1 %126  ;;  %v122_v11 = vpop.permute.xlu0 %121 }
  0xa1   :  { %292 = vst [vmem:[#allocation5 + $0x50] sm:$0xff] %v251_v6  ;;  %293 = vst.msk [vmem:[#allocation5 + $0x58] sm:$0xff] %vm282_vm0, %v252_v7  ;;  %v203_v12 = vmul.f32 %v127_v10, %v43_v2  ;;  %v204_v13 = vmul.f32 %v127_v10, %v44_v3  ;;  %v201_v14 = vmul.f32 %v122_v11, %v41_v4  ;;  %v63_v10 = vld [vmem:[#allocation2 + $0x110] sm:$0xff] }
  0xa2   :  { %290 = vst [vmem:[#allocation5 + $0x40] sm:$0xff] %v249_v8  ;;  %291 = vst.msk [vmem:[#allocation5 + $0x48] sm:$0xff] %vm282_vm0, %v250_v9  ;;  %v202_v15 = vmul.f32 %v122_v11, %v42_v5  ;;  %v64_v11 = vld [vmem:[#allocation2 + $0x118] sm:$0xff] }
  0xa3   :  { %v255_v20 = vmul.f32 %v497_v30, %v203_v12  ;;  %v256_v21 = vmul.f32 %v499_v31, %v204_v13  ;;  %v253_v22 = vmul.f32 %v497_v30, %v201_v14  ;;  %v61_v12 = vld [vmem:[#allocation2 + $0x100] sm:$0xff]  ;;  %v62_v13 = vld [vmem:[#allocation2 + $0x108] sm:$0xff] }
  0xa4   :  { %v254_v23 = vmul.f32 %v499_v31, %v202_v15  ;;  %v137_v24 = vpop.permute.xlu1 %136  ;;  %v132_v25 = vpop.permute.xlu0 %131 }
  0xa5   :  { %296 = vst [vmem:[#allocation5 + $0x70] sm:$0xff] %v255_v20  ;;  %297 = vst.msk [vmem:[#allocation5 + $0x78] sm:$0xff] %vm282_vm0, %v256_v21  ;;  %v207_v26 = vmul.f32 %v137_v24, %v47_v16  ;;  %v208_v27 = vmul.f32 %v137_v24, %v48_v17  ;;  %v205_v28 = vmul.f32 %v132_v25, %v45_v18  ;;  %v67_v24 = vld [vmem:[#allocation2 + $0x130] sm:$0xff] }
  0xa6   :  { %294 = vst [vmem:[#allocation5 + $0x60] sm:$0xff] %v253_v22  ;;  %295 = vst.msk [vmem:[#allocation5 + $0x68] sm:$0xff] %vm282_vm0, %v254_v23  ;;  %v206_v29 = vmul.f32 %v132_v25, %v46_v19  ;;  %v68_v25 = vld [vmem:[#allocation2 + $0x138] sm:$0xff] }
  0xa7   :  { %v259_v36 = vmul.f32 %v497_v30, %v207_v26  ;;  %v260_v37 = vmul.f32 %v499_v31, %v208_v27  ;;  %v257_v38 = vmul.f32 %v497_v30, %v205_v28  ;;  %v65_v26 = vld [vmem:[#allocation2 + $0x120] sm:$0xff]  ;;  %v66_v27 = vld [vmem:[#allocation2 + $0x128] sm:$0xff] }
  0xa8   :  { %v258_v39 = vmul.f32 %v499_v31, %v206_v29  ;;  %v147_v40 = vpop.permute.xlu1 %146  ;;  %v142_v41 = vpop.permute.xlu0 %141 }
  0xa9   :  { %300 = vst [vmem:[#allocation5 + $0x90] sm:$0xff] %v259_v36  ;;  %301 = vst.msk [vmem:[#allocation5 + $0x98] sm:$0xff] %vm282_vm0, %v260_v37  ;;  %v211_v42 = vmul.f32 %v147_v40, %v51_v32  ;;  %v212_v43 = vmul.f32 %v147_v40, %v52_v33  ;;  %v209_v44 = vmul.f32 %v142_v41, %v49_v34 }
  0xaa   :  { %298 = vst [vmem:[#allocation5 + $0x80] sm:$0xff] %v257_v38  ;;  %299 = vst.msk [vmem:[#allocation5 + $0x88] sm:$0xff] %vm282_vm0, %v258_v39  ;;  %v210_v45 = vmul.f32 %v142_v41, %v50_v35 }
  0xab   :  { %v263_v50 = vmul.f32 %v497_v30, %v211_v42  ;;  %v264_v51 = vmul.f32 %v499_v31, %v212_v43  ;;  %v261_v52 = vmul.f32 %v497_v30, %v209_v44 }
  0xac   :  { %v262_v53 = vmul.f32 %v499_v31, %v210_v45  ;;  %v157_v54 = vpop.permute.xlu1 %156  ;;  %v152_v55 = vpop.permute.xlu0 %151 }
  0xad   :  { %304 = vst [vmem:[#allocation5 + $0xb0] sm:$0xff] %v263_v50  ;;  %305 = vst.msk [vmem:[#allocation5 + $0xb8] sm:$0xff] %vm282_vm0, %v264_v51  ;;  %v215_v56 = vmul.f32 %v157_v54, %v55_v46  ;;  %v216_v57 = vmul.f32 %v157_v54, %v56_v47  ;;  %v213_v58 = vmul.f32 %v152_v55, %v53_v48 }
  0xae   :  { %302 = vst [vmem:[#allocation5 + $0xa0] sm:$0xff] %v261_v52  ;;  %303 = vst.msk [vmem:[#allocation5 + $0xa8] sm:$0xff] %vm282_vm0, %v262_v53  ;;  %v214_v59 = vmul.f32 %v152_v55, %v54_v49 }
  0xaf   :  { %v267_v0 = vmul.f32 %v497_v30, %v215_v56  ;;  %v268_v1 = vmul.f32 %v499_v31, %v216_v57  ;;  %v265_v2 = vmul.f32 %v497_v30, %v213_v58 }
  0xb0   :  { %v266_v3 = vmul.f32 %v499_v31, %v214_v59  ;;  %v167_v4 = vpop.permute.xlu1 %166  ;;  %v162_v5 = vpop.permute.xlu0 %161 }
  0xb1   :  { %308 = vst [vmem:[#allocation5 + $0xd0] sm:$0xff] %v267_v0  ;;  %309 = vst.msk [vmem:[#allocation5 + $0xd8] sm:$0xff] %vm282_vm0, %v268_v1  ;;  %v219_v6 = vmul.f32 %v167_v4, %v59_v60  ;;  %v220_v7 = vmul.f32 %v167_v4, %v60_v61  ;;  %v217_v8 = vmul.f32 %v162_v5, %v57_v62 }
  0xb2   :  { %306 = vst [vmem:[#allocation5 + $0xc0] sm:$0xff] %v265_v2  ;;  %307 = vst.msk [vmem:[#allocation5 + $0xc8] sm:$0xff] %vm282_vm0, %v266_v3  ;;  %v218_v9 = vmul.f32 %v162_v5, %v58_v63 }
  0xb3   :  { %v271_v14 = vmul.f32 %v497_v30, %v219_v6  ;;  %v272_v15 = vmul.f32 %v499_v31, %v220_v7  ;;  %v269_v16 = vmul.f32 %v497_v30, %v217_v8 }
  0xb4   :  { %v270_v17 = vmul.f32 %v499_v31, %v218_v9  ;;  %v177_v18 = vpop.permute.xlu1 %176  ;;  %v172_v19 = vpop.permute.xlu0 %171 }
  0xb5   :  { %312 = vst [vmem:[#allocation5 + $0xf0] sm:$0xff] %v271_v14  ;;  %313 = vst.msk [vmem:[#allocation5 + $0xf8] sm:$0xff] %vm282_vm0, %v272_v15  ;;  %v223_v20 = vmul.f32 %v177_v18, %v63_v10  ;;  %v224_v21 = vmul.f32 %v177_v18, %v64_v11  ;;  %v221_v22 = vmul.f32 %v172_v19, %v61_v12 }
  0xb6   :  { %310 = vst [vmem:[#allocation5 + $0xe0] sm:$0xff] %v269_v16  ;;  %311 = vst.msk [vmem:[#allocation5 + $0xe8] sm:$0xff] %vm282_vm0, %v270_v17  ;;  %v222_v23 = vmul.f32 %v172_v19, %v62_v13 }
  0xb7   :  { %v275_v28 = vmul.f32 %v497_v30, %v223_v20  ;;  %v276_v29 = vmul.f32 %v499_v31, %v224_v21  ;;  %v273_v32 = vmul.f32 %v497_v30, %v221_v22 }
  0xb8   :  { %v274_v33 = vmul.f32 %v499_v31, %v222_v23  ;;  %v187_v34 = vpop.permute.xlu1 %186  ;;  %v182_v35 = vpop.permute.xlu0 %181 }
  0xb9   :  { %316 = vst [vmem:[#allocation5 + $0x110] sm:$0xff] %v275_v28  ;;  %317 = vst.msk [vmem:[#allocation5 + $0x118] sm:$0xff] %vm282_vm0, %v276_v29  ;;  %v227_v36 = vmul.f32 %v187_v34, %v67_v24  ;;  %v228_v37 = vmul.f32 %v187_v34, %v68_v25  ;;  %v225_v38 = vmul.f32 %v182_v35, %v65_v26 }
  0xba   :  { %314 = vst [vmem:[#allocation5 + $0x100] sm:$0xff] %v273_v32  ;;  %315 = vst.msk [vmem:[#allocation5 + $0x108] sm:$0xff] %vm282_vm0, %v274_v33  ;;  %v226_v39 = vmul.f32 %v182_v35, %v66_v27 }
  0xbb   :  { %v279_v40 = vmul.f32 %v497_v30, %v227_v36  ;;  %v280_v41 = vmul.f32 %v499_v31, %v228_v37  ;;  %v277_v42 = vmul.f32 %v497_v30, %v225_v38 }
  0xbc   :  { %v278_v43 = vmul.f32 %v499_v31, %v226_v39 }
  0xbd   :  { %320 = vst [vmem:[#allocation5 + $0x130] sm:$0xff] %v279_v40  ;;  %321 = vst.msk [vmem:[#allocation5 + $0x138] sm:$0xff] %vm282_vm0, %v280_v41 }
  0xbe   :  { %318 = vst [vmem:[#allocation5 + $0x120] sm:$0xff] %v277_v42  ;;  %319 = vst.msk [vmem:[#allocation5 + $0x128] sm:$0xff] %vm282_vm0, %v278_v43 }
  0xbf   :  { %379 = shalt.err (!%p376_p12)
}
  0xc0   :  { %s380_s17 = scalar_lea.hbm %s579_s3, 5120 }
  0xc1   :  { %p381_p13 = scmp.ne.s32.totalorder %s579_s3, %s380_s17  ;;  %p384_p0 = scmp.lt.u32.totalorder %s380_s17, %s579_s3 }
  0xc3   :  { %p386_p1 = pnand %p384_p0, %p381_p13 }
  0xc5   :  { %389 = shalt.err (!%p386_p1)
}
  0xc6   :  { %333 = dma.vmem_to_hbm [thread:$0]  %s328_s2, 5120, %s579_s3, [#allocation4], %s395_s22, %s395_s22, %s396_s23  }
  0xc7   :  { %392 = dma.done.wait [#allocation4], 5120  }
  0xc8   :  { %393 = vsyncadd [#allocation4], 4294962176 }
  0xc9   :  { %337 = vsyncpa [#allocation3], 1 }
  0xca   :  { %338 = vsyncpa [#allocation4], 1 }

</bundles_post_ra>
